<compile_context>
chip_gen: v7x
topology: tpu7x:2x2x1
jax: 0.10.0
libtpu: 0.0.40
codegen_flags: <defaults>
</compile_context>

<pallas_src>
import math
from functools import lru_cache, partial

import jax
import jax.numpy as jnp
import numpy as np
from jax.experimental import pallas as pl
from jax.experimental.pallas import tpu as pltpu


# ----------------------------------------------------------------------------
# Host-side construction of the separable upfirdn matrices (vectorized, memoized)
# ----------------------------------------------------------------------------
@lru_cache(maxsize=None)
def _upfirdn1d_matrix(n_in, taps, up, pad0, pad1):
    """Dense [n_out, n_in] matrix M such that (M @ x) == 1-D upfirdn(x) with
    zero-insertion upsampling by `up`, zero padding (pad0, pad1) and correlation
    with the flipped `taps` (matching StyleGAN2's upfirdn2d_native)."""
    taps_arr = np.asarray(taps, dtype=np.float64)
    T = taps_arr.shape[0]
    n_out = n_in * up + pad0 + pad1 - T + 1
    o = np.arange(n_out)[:, None]
    i = np.arange(n_in)[None, :]
    a = i * up + pad0 - o                       # position of x[i] in out[o]'s window
    valid = (a >= 0) & (a < T)
    idx = np.clip(T - 1 - a, 0, T - 1)
    return np.where(valid, taps_arr[idx], 0.0).astype(np.float32)


def _vmem_budget_bytes():
    """Generation-aware VMEM budget: 3/4 of the per-core capacity
    (~48 MiB on v7x, ~96 MiB on v5e/v6e)."""
    try:
        cap = int(pltpu.get_tpu_info().vmem_capacity_bytes)
    except Exception:
        cap = 64 * 2 ** 20
    return int(min(cap * 3 // 4, 112 * 2 ** 20))


def _select_tiles(N, H, W, Hout, Wout, x_bytes, out_bytes, const_bytes, budget):
    """Pick (planes per grid step P, output row tile th) from an explicit byte
    budget that accounts for double buffering and f32 temporaries."""
    if H <= 64 and W <= 64:
        # Small feature maps: batch planes per step (amortize grid overhead,
        # fill the MXU).  P capped at 32 to bound in-kernel unrolling.
        for cand in range(min(N, 32), 0, -1):
            if N % cand:
                continue
            need = (const_bytes
                    + 2 * cand * H * W * x_bytes            # x block (double buffered)
                    + 2 * cand * Hout * Wout * out_bytes    # out block (double buffered)
                    + cand * H * Wout * 4                   # f32 intermediate
                    + cand * Hout * Wout * 4)               # f32 result before cast
            if need <= budget:
                return cand, Hout
        return 1, Hout
    # Large planes: one plane per step; row-tile the output if needed.
    cands = [Hout] + [t for t in (2048, 1024, 512, 256, 128, 64, 32, 16, 8)
                      if t < Hout and Hout % t == 0]
    for th in cands:
        need = (const_bytes
                + 2 * H * W * x_bytes
                + 2 * th * Wout * out_bytes
                + th * W * 4 + th * Wout * 4)
        if need <= budget:
            return 1, th
    # Only reachable for enormous planes; fall through with the smallest tile.
    # (Further headroom would come from Wout column tiling / banded Mh.)
    return 1, cands[-1]


# ----------------------------------------------------------------------------
# Pallas kernel: out_tile = Mh_tile @ x @ Mw   (per plane, or batched planes)
# ----------------------------------------------------------------------------
def _upsample_kernel(x_ref, mh_ref, mw_ref, o_ref, *, compute_dtype):
    P, H, W = x_ref.shape
    th = o_ref.shape[1]
    Hout = mh_ref.shape[0]
    mw = mw_ref[...]                                    # (W, Wout), VMEM-resident

    if P == 1:
        # Large-plane path: Mh is fully resident; slice the current row tile.
        if th == Hout:
            mh_tile = mh_ref[...]
        else:
            row0 = pl.multiple_of(pl.program_id(1) * th, th)
            mh_tile = mh_ref[pl.ds(row0, th), :]        # (th, H)
        xb = x_ref[0].astype(compute_dtype)             # (H, W)
        t = jnp.dot(mh_tile, xb, preferred_element_type=jnp.float32)        # (th, W)
        z = jnp.dot(t.astype(compute_dtype), mw, preferred_element_type=jnp.float32)
        o_ref[0] = z.astype(o_ref.dtype)
    else:
        # Small-plane batched path (th == Hout by construction).
        mh = mh_ref[...]                                # (Hout, H)
        if H % 8 == 0:
            # Merge planes so the width matmul sees M = P*H (layout-preserving
            # collapse: H is a multiple of the sublane tile).
            xb = x_ref[...].astype(compute_dtype).reshape(P * H, W)
            t = jnp.dot(xb, mw, preferred_element_type=jnp.float32)         # (P*H, Wout)
            t = t.astype(compute_dtype)
            for p in range(P):                          # static unroll, P <= 32
                z = jnp.dot(mh, t[p * H:(p + 1) * H, :],
                            preferred_element_type=jnp.float32)             # (Hout, Wout)
                o_ref[p] = z.astype(o_ref.dtype)
        else:
            for p in range(P):
                xb = x_ref[p].astype(compute_dtype)
                t = jnp.dot(mh, xb, preferred_element_type=jnp.float32)
                z = jnp.dot(t.astype(compute_dtype), mw,
                            preferred_element_type=jnp.float32)
                o_ref[p] = z.astype(o_ref.dtype)


def upsample(x, kernel=(1.0, 3.0, 3.0, 1.0), factor=2, compute_dtype=jnp.bfloat16):
    """Forward pass of StyleGAN2 Upsample: upfirdn2d(x, make_kernel(k)*factor**2,
    up=factor, down=1, pad=(pad0, pad1)).  x: [B, C, H, W] -> [B, C, H*f, W*f]."""
    B, C, H, W = x.shape
    k1 = np.asarray(kernel, dtype=np.float32)
    if k1.ndim != 1:
        # TODO(synk): non-separable 2-D FIR kernels (Upsample always uses a 1-D kernel).
        raise NotImplementedError("only 1-D (separable) blur kernels are supported")

    # make_kernel(k) * factor**2 is separable: per-axis taps g = k / sum(k) * factor
    g = k1 / k1.sum() * float(factor)
    T = k1.shape[0]
    p = T - factor
    pad0 = (p + 1) // 2 + factor - 1
    pad1 = p // 2
    taps = tuple(float(v) for v in g)

    cdt = jnp.dtype(compute_dtype)
    mh = jnp.asarray(_upfirdn1d_matrix(H, taps, factor, pad0, pad1), dtype=cdt)     # [Hout, H]
    mw = jnp.asarray(_upfirdn1d_matrix(W, taps, factor, pad0, pad1).T, dtype=cdt)   # [W, Wout]
    Hout, Wout = mh.shape[0], mw.shape[1]

    N = B * C
    x2 = x.reshape(N, H, W)
    xb_sz = jnp.dtype(x.dtype).itemsize

    budget = _vmem_budget_bytes()
    const_bytes = 2 * (Hout * H + W * Wout) * cdt.itemsize     # Mh + Mw (double buffered)
    P, th = _select_tiles(N, H, W, Hout, Wout, xb_sz, xb_sz, const_bytes, budget)

    out = pl.pallas_call(
        partial(_upsample_kernel, compute_dtype=cdt),
        out_shape=jax.ShapeDtypeStruct((N, Hout, Wout), x.dtype),
        grid=(N // P, Hout // th),
        in_specs=[
            pl.BlockSpec((P, H, W), lambda n, i: (n, 0, 0)),    # planes (resident across i)
            pl.BlockSpec((Hout, H), lambda n, i: (0, 0)),       # Mh, VMEM-resident (DMA'd once)
            pl.BlockSpec((W, Wout), lambda n, i: (0, 0)),       # Mw, VMEM-resident (DMA'd once)
        ],
        out_specs=pl.BlockSpec((P, th, Wout), lambda n, i: (n, i, 0)),
        compiler_params=pltpu.CompilerParams(
            dimension_semantics=("parallel", "parallel"),
            vmem_limit_bytes=budget,
        ),
    )(x2, mh, mw)
    return out.reshape(B, C, Hout, Wout)


# ----------------------------------------------------------------------------
# Pure-JAX reference (upfirdn2d_native semantics) for correctness checking
# ----------------------------------------------------------------------------
def _upfirdn2d_ref(x, k2d, up, pad0, pad1):
    B, C, H, W = x.shape
    kh, kw = k2d.shape
    xu = jnp.zeros((B, C, H * up, W * up), x.dtype).at[:, :, ::up, ::up].set(x)
    xp = jnp.pad(xu, ((0, 0), (0, 0), (pad0, pad1), (pad0, pad1)))
    kf = k2d[::-1, ::-1]
    Ho = xp.shape[2] - kh + 1
    Wo = xp.shape[3] - kw + 1
    out = jnp.zeros((B, C, Ho, Wo), x.dtype)
    for dy in range(kh):
        for dx in range(kw):
            out = out + kf[dy, dx] * xp[:, :, dy:dy + Ho, dx:dx + Wo]
    return out


if __name__ == "__main__":
    key = jax.random.PRNGKey(0)
    factor = 2
    k1 = np.asarray([1.0, 3.0, 3.0, 1.0], dtype=np.float32)

    def check(shape):
        x = jax.random.normal(jax.random.fold_in(key, shape[-1]), shape, dtype=jnp.float32)
        out = jax.block_until_ready(upsample(x, kernel=k1, factor=factor))
        B, C, H, W = shape
        assert out.shape == (B, C, H * factor, W * factor), out.shape

        k2d = np.outer(k1, k1)
        k2d = k2d / k2d.sum() * factor ** 2
        p = k1.shape[0] - factor
        pad0, pad1 = (p + 1) // 2 + factor - 1, p // 2
        ref = jax.block_until_ready(
            _upfirdn2d_ref(x, jnp.asarray(k2d), factor, pad0, pad1))
        err = float(jnp.max(jnp.abs(out - ref)))
        # bf16 MXU operands with f32 accumulation -> bounded ~1e-2 error.
        assert np.isfinite(err) and err < 5e-2, f"max abs err {err} for shape {shape}"
        assert bool(jnp.all(jnp.isfinite(out)))

    check((2, 4, 16, 16))   # small-plane batched path (P > 1, merged width matmul)
    check((1, 2, 72, 72))   # single-plane path (P == 1, full-plane row tile)
    print("KERNEL_OK")
</pallas_src>

<mosaic_0001>
module attributes {stable_mosaic.version = 11 : i64} {
  func.func @_upsample_kernel(%arg0: i32, %arg1: i32, %arg2: memref<8x16x16xf32, #tpu.memory_space<vmem>>, %arg3: memref<32x16xbf16, #tpu.memory_space<vmem>>, %arg4: memref<16x32xbf16, #tpu.memory_space<vmem>>, %arg5: memref<8x32x32xf32, #tpu.memory_space<vmem>>) attributes {dimension_semantics = [#tpu.dimension_semantics<parallel>, #tpu.dimension_semantics<parallel>], iteration_bounds = array<i64: 1, 1>, scalar_prefetch = 0 : i64, scratch_operands = 0 : i64, tpu.core_type = #tpu.core_type<tc>, window_params = [{transform_indices = @transform_0, window_bounds = array<i64: 8, 16, 16>}, {pipeline_mode = #tpu.pipeline_mode<synchronous>, transform_indices = @transform_1, window_bounds = array<i64: 32, 16>}, {pipeline_mode = #tpu.pipeline_mode<synchronous>, transform_indices = @transform_2, window_bounds = array<i64: 16, 32>}, {transform_indices = @transform_3, window_bounds = array<i64: 8, 32, 32>}]} {
    %c0 = arith.constant 0 : index
    %c0_0 = arith.constant 0 : index
    %0 = vector.load %arg4[%c0, %c0_0] : memref<16x32xbf16, #tpu.memory_space<vmem>>, vector<16x32xbf16>
    %c0_1 = arith.constant 0 : index
    %c0_2 = arith.constant 0 : index
    %1 = vector.load %arg3[%c0_1, %c0_2] : memref<32x16xbf16, #tpu.memory_space<vmem>>, vector<32x16xbf16>
    %c0_3 = arith.constant 0 : index
    %c0_4 = arith.constant 0 : index
    %c0_5 = arith.constant 0 : index
    %2 = vector.load %arg2[%c0_3, %c0_4, %c0_5] : memref<8x16x16xf32, #tpu.memory_space<vmem>>, vector<8x16x16xf32>
    %3 = arith.truncf %2 : vector<8x16x16xf32> to vector<8x16x16xbf16>
    %4 = vector.shape_cast %3 : vector<8x16x16xbf16> to vector<128x16xbf16>
    %cst = arith.constant dense<0.000000e+00> : vector<128x32xf32>
    %5 = tpu.matmul %4, %0, %cst {dimension_numbers = #tpu.dot_dimension_numbers<[1], [0], [0], [1], [0, 0, 1, 1], [], []>} : vector<128x16xbf16>, vector<16x32xbf16>, vector<128x32xf32> -> vector<128x32xf32>
    %6 = arith.truncf %5 : vector<128x32xf32> to vector<128x32xbf16>
    %7 = vector.extract_strided_slice %6 {offsets = [0, 0], sizes = [16, 32], strides = [1, 1]} : vector<128x32xbf16> to vector<16x32xbf16>
    %cst_6 = arith.constant dense<0.000000e+00> : vector<32x32xf32>
    %8 = tpu.matmul %1, %7, %cst_6 {dimension_numbers = #tpu.dot_dimension_numbers<[1], [0], [0], [1], [0, 0, 1, 1], [], []>} : vector<32x16xbf16>, vector<16x32xbf16>, vector<32x32xf32> -> vector<32x32xf32>
    %c0_7 = arith.constant 0 : index
    %c0_8 = arith.constant 0 : index
    %c0_9 = arith.constant 0 : index
    %9 = vector.load %arg5[%c0_7, %c0_8, %c0_9] : memref<8x32x32xf32, #tpu.memory_space<vmem>>, vector<1x32x32xf32>
    %10 = vector.shape_cast %9 : vector<1x32x32xf32> to vector<32x32xf32>
    %11 = vector.shape_cast %8 : vector<32x32xf32> to vector<1x32x32xf32>
    tpu.vector_store %arg5[%c0_7, %c0_8, %c0_9], %11 {strides = array<i32>} : memref<8x32x32xf32, #tpu.memory_space<vmem>>, vector<1x32x32xf32>,
    %12 = vector.extract_strided_slice %6 {offsets = [16, 0], sizes = [16, 32], strides = [1, 1]} : vector<128x32xbf16> to vector<16x32xbf16>
    %cst_10 = arith.constant dense<0.000000e+00> : vector<32x32xf32>
    %13 = tpu.matmul %1, %12, %cst_10 {dimension_numbers = #tpu.dot_dimension_numbers<[1], [0], [0], [1], [0, 0, 1, 1], [], []>} : vector<32x16xbf16>, vector<16x32xbf16>, vector<32x32xf32> -> vector<32x32xf32>
    %c1 = arith.constant 1 : index
    %c0_11 = arith.constant 0 : index
    %c0_12 = arith.constant 0 : index
    %14 = vector.load %arg5[%c1, %c0_11, %c0_12] : memref<8x32x32xf32, #tpu.memory_space<vmem>>, vector<1x32x32xf32>
    %15 = vector.shape_cast %14 : vector<1x32x32xf32> to vector<32x32xf32>
    %16 = vector.shape_cast %13 : vector<32x32xf32> to vector<1x32x32xf32>
    tpu.vector_store %arg5[%c1, %c0_11, %c0_12], %16 {strides = array<i32>} : memref<8x32x32xf32, #tpu.memory_space<vmem>>, vector<1x32x32xf32>,
    %17 = vector.extract_strided_slice %6 {offsets = [32, 0], sizes = [16, 32], strides = [1, 1]} : vector<128x32xbf16> to vector<16x32xbf16>
    %cst_13 = arith.constant dense<0.000000e+00> : vector<32x32xf32>
    %18 = tpu.matmul %1, %17, %cst_13 {dimension_numbers = #tpu.dot_dimension_numbers<[1], [0], [0], [1], [0, 0, 1, 1], [], []>} : vector<32x16xbf16>, vector<16x32xbf16>, vector<32x32xf32> -> vector<32x32xf32>
    %c2 = arith.constant 2 : index
    %c0_14 = arith.constant 0 : index
    %c0_15 = arith.constant 0 : index
    %19 = vector.load %arg5[%c2, %c0_14, %c0_15] : memref<8x32x32xf32, #tpu.memory_space<vmem>>, vector<1x32x32xf32>
    %20 = vector.shape_cast %19 : vector<1x32x32xf32> to vector<32x32xf32>
    %21 = vector.shape_cast %18 : vector<32x32xf32> to vector<1x32x32xf32>
    tpu.vector_store %arg5[%c2, %c0_14, %c0_15], %21 {strides = array<i32>} : memref<8x32x32xf32, #tpu.memory_space<vmem>>, vector<1x32x32xf32>,
    %22 = vector.extract_strided_slice %6 {offsets = [48, 0], sizes = [16, 32], strides = [1, 1]} : vector<128x32xbf16> to vector<16x32xbf16>
    %cst_16 = arith.constant dense<0.000000e+00> : vector<32x32xf32>
    %23 = tpu.matmul %1, %22, %cst_16 {dimension_numbers = #tpu.dot_dimension_numbers<[1], [0], [0], [1], [0, 0, 1, 1], [], []>} : vector<32x16xbf16>, vector<16x32xbf16>, vector<32x32xf32> -> vector<32x32xf32>
    %c3 = arith.constant 3 : index
    %c0_17 = arith.constant 0 : index
    %c0_18 = arith.constant 0 : index
    %24 = vector.load %arg5[%c3, %c0_17, %c0_18] : memref<8x32x32xf32, #tpu.memory_space<vmem>>, vector<1x32x32xf32>
    %25 = vector.shape_cast %24 : vector<1x32x32xf32> to vector<32x32xf32>
    %26 = vector.shape_cast %23 : vector<32x32xf32> to vector<1x32x32xf32>
    tpu.vector_store %arg5[%c3, %c0_17, %c0_18], %26 {strides = array<i32>} : memref<8x32x32xf32, #tpu.memory_space<vmem>>, vector<1x32x32xf32>,
    %27 = vector.extract_strided_slice %6 {offsets = [64, 0], sizes = [16, 32], strides = [1, 1]} : vector<128x32xbf16> to vector<16x32xbf16>
    %cst_19 = arith.constant dense<0.000000e+00> : vector<32x32xf32>
    %28 = tpu.matmul %1, %27, %cst_19 {dimension_numbers = #tpu.dot_dimension_numbers<[1], [0], [0], [1], [0, 0, 1, 1], [], []>} : vector<32x16xbf16>, vector<16x32xbf16>, vector<32x32xf32> -> vector<32x32xf32>
    %c4 = arith.constant 4 : index
    %c0_20 = arith.constant 0 : index
    %c0_21 = arith.constant 0 : index
    %29 = vector.load %arg5[%c4, %c0_20, %c0_21] : memref<8x32x32xf32, #tpu.memory_space<vmem>>, vector<1x32x32xf32>
    %30 = vector.shape_cast %29 : vector<1x32x32xf32> to vector<32x32xf32>
    %31 = vector.shape_cast %28 : vector<32x32xf32> to vector<1x32x32xf32>
    tpu.vector_store %arg5[%c4, %c0_20, %c0_21], %31 {strides = array<i32>} : memref<8x32x32xf32, #tpu.memory_space<vmem>>, vector<1x32x32xf32>,
    %32 = vector.extract_strided_slice %6 {offsets = [80, 0], sizes = [16, 32], strides = [1, 1]} : vector<128x32xbf16> to vector<16x32xbf16>
    %cst_22 = arith.constant dense<0.000000e+00> : vector<32x32xf32>
    %33 = tpu.matmul %1, %32, %cst_22 {dimension_numbers = #tpu.dot_dimension_numbers<[1], [0], [0], [1], [0, 0, 1, 1], [], []>} : vector<32x16xbf16>, vector<16x32xbf16>, vector<32x32xf32> -> vector<32x32xf32>
    %c5 = arith.constant 5 : index
    %c0_23 = arith.constant 0 : index
    %c0_24 = arith.constant 0 : index
    %34 = vector.load %arg5[%c5, %c0_23, %c0_24] : memref<8x32x32xf32, #tpu.memory_space<vmem>>, vector<1x32x32xf32>
    %35 = vector.shape_cast %34 : vector<1x32x32xf32> to vector<32x32xf32>
    %36 = vector.shape_cast %33 : vector<32x32xf32> to vector<1x32x32xf32>
    tpu.vector_store %arg5[%c5, %c0_23, %c0_24], %36 {strides = array<i32>} : memref<8x32x32xf32, #tpu.memory_space<vmem>>, vector<1x32x32xf32>,
    %37 = vector.extract_strided_slice %6 {offsets = [96, 0], sizes = [16, 32], strides = [1, 1]} : vector<128x32xbf16> to vector<16x32xbf16>
    %cst_25 = arith.constant dense<0.000000e+00> : vector<32x32xf32>
    %38 = tpu.matmul %1, %37, %cst_25 {dimension_numbers = #tpu.dot_dimension_numbers<[1], [0], [0], [1], [0, 0, 1, 1], [], []>} : vector<32x16xbf16>, vector<16x32xbf16>, vector<32x32xf32> -> vector<32x32xf32>
    %c6 = arith.constant 6 : index
    %c0_26 = arith.constant 0 : index
    %c0_27 = arith.constant 0 : index
    %39 = vector.load %arg5[%c6, %c0_26, %c0_27] : memref<8x32x32xf32, #tpu.memory_space<vmem>>, vector<1x32x32xf32>
    %40 = vector.shape_cast %39 : vector<1x32x32xf32> to vector<32x32xf32>
    %41 = vector.shape_cast %38 : vector<32x32xf32> to vector<1x32x32xf32>
    tpu.vector_store %arg5[%c6, %c0_26, %c0_27], %41 {strides = array<i32>} : memref<8x32x32xf32, #tpu.memory_space<vmem>>, vector<1x32x32xf32>,
    %42 = vector.extract_strided_slice %6 {offsets = [112, 0], sizes = [16, 32], strides = [1, 1]} : vector<128x32xbf16> to vector<16x32xbf16>
    %cst_28 = arith.constant dense<0.000000e+00> : vector<32x32xf32>
    %43 = tpu.matmul %1, %42, %cst_28 {dimension_numbers = #tpu.dot_dimension_numbers<[1], [0], [0], [1], [0, 0, 1, 1], [], []>} : vector<32x16xbf16>, vector<16x32xbf16>, vector<32x32xf32> -> vector<32x32xf32>
    %c7 = arith.constant 7 : index
    %c0_29 = arith.constant 0 : index
    %c0_30 = arith.constant 0 : index
    %44 = vector.load %arg5[%c7, %c0_29, %c0_30] : memref<8x32x32xf32, #tpu.memory_space<vmem>>, vector<1x32x32xf32>
    %45 = vector.shape_cast %44 : vector<1x32x32xf32> to vector<32x32xf32>
    %46 = vector.shape_cast %43 : vector<32x32xf32> to vector<1x32x32xf32>
    tpu.vector_store %arg5[%c7, %c0_29, %c0_30], %46 {strides = array<i32>} : memref<8x32x32xf32, #tpu.memory_space<vmem>>, vector<1x32x32xf32>,
    return
  }
  func.func @transform_0(%arg0: i32, %arg1: i32) -> (i32, i32, i32) {
    %c0_i32 = arith.constant 0 : i32
    %c0_i32_0 = arith.constant 0 : i32
    %c0_i32_1 = arith.constant 0 : i32
    return %arg0, %c0_i32, %c0_i32_0 : i32, i32, i32
  }
  func.func @transform_1(%arg0: i32, %arg1: i32) -> (i32, i32) {
    %c0_i32 = arith.constant 0 : i32
    %c0_i32_0 = arith.constant 0 : i32
    %c0_i32_1 = arith.constant 0 : i32
    return %c0_i32, %c0_i32_0 : i32, i32
  }
  func.func @transform_2(%arg0: i32, %arg1: i32) -> (i32, i32) {
    %c0_i32 = arith.constant 0 : i32
    %c0_i32_0 = arith.constant 0 : i32
    %c0_i32_1 = arith.constant 0 : i32
    return %c0_i32, %c0_i32_0 : i32, i32
  }
  func.func @transform_3(%arg0: i32, %arg1: i32) -> (i32, i32, i32) {
    %c0_i32 = arith.constant 0 : i32
    %c0_i32_0 = arith.constant 0 : i32
    return %arg0, %arg1, %c0_i32 : i32, i32, i32
  }
}

</mosaic_0001>

<bundles_post_ra>
// kernel: tpu_custom_call.1
= control target key start
LH: loop header
LB: loop body
LE: loop exit
PB: predicated region body
PF: predicated region fallthrough
CT: control target
= control target key end

     0   :  { %8 = vsyncpa [#allocation3], 0  ;;  %s961_s0 = inlined_call_operand.hbm [shape: f32[8,16,16], index: 0, kind: input, shape index: {}]   ;;  %s962_s1 = inlined_call_operand.vmem [shape: bf16[32,16], index: 1, kind: input, shape index: {}]   ;;  %s963_s2 = inlined_call_operand.vmem [shape: bf16[16,32], index: 2, kind: input, shape index: {}]   ;;  %s964_s3 = inlined_call_operand.hbm [shape: f32[8,32,32], index: 3, kind: output, shape index: {}]  }
   0x1   :  { %9 = vsyncpa [#allocation4], 0  ;;  %s842_s12 = smov [#allocation2]   ;;  %s794_s16 = scalar_lea.hbm %s961_s0, 2048 }
   0x2   :  { %s15_s13 = sshll.u32 %s842_s12, 4  ;;  %p795_p0 = scmp.ne.s32.totalorder %s961_s0, %s794_s16  ;;  %s16_s13 = int_to_ptr.vmem [resolvable:$true] %s15_s13 }
   0x3   :  { %p798_p1 = scmp.lt.u32.totalorder %s794_s16, %s961_s0 }
   0x5   :  { %p800_p2 = pnand %p798_p1, %p795_p0 }
   0x7   :  { %803 = shalt.err (!%p800_p2)
}
   0x8   :  { %s804_s21 = scalar_lea.vmem %s16_s13, 2048  ;;  %p809_p4 = scmp.lt.s32.totalorder %s16_s13, %s16_s13 }
   0x9   :  { %p805_p3 = scmp.ne.s32.totalorder %s16_s13, %s804_s21  ;;  %p810_p5 = scmp.lt.s32.totalorder %s804_s21, %s804_s21 }
   0xb   :  { %p811_p6 = por %p810_p5, %p809_p4 }
   0xd   :  { %p812_p7 = pnand %p811_p6, %p805_p3 }
   0xf   :  { %815 = shalt.err (!%p812_p7)
}
  0x10   :  { %s843_s22 = smov 128   ;;  %s844_s23 = smov 8  }
  0x11   :  { %21 = dma.hbm_to_vmem [thread:$0]  %s961_s0, 2048, %s16_s13, [#allocation3], %s843_s22, %s843_s22, %s844_s23  }
  0x12   :  { %838 = dma.done.wait [#allocation3], 2048  }
  0x13   :  { %839 = vsyncadd [#allocation3], 4294965248  ;;  %v791_v0 = vld [vmem:[%s963_s2] sm:$0xff]   ;;  %v37_v2 = vld [vmem:[#allocation2 + $0x8] sm:$0xff]  ;;  %vm66_vm0 = vcmask 130048   ;;  %vm261_vm1 = vcmask 261120  }
  0x14   :  { %v36_v1 = vld [vmem:[#allocation2] sm:$0xff]  ;;  %v38_v3 = vld [vmem:[#allocation2 + $0x10] sm:$0xff]  ;;  %721 = vmatprep.subr.bf16.mxu0 %v791_v0  ;;  %v39_v5 = vld [vmem:[#allocation2 + $0x18] sm:$0xff] }
  0x15   :  { %v52_v4 = vpack.c.bf16 %v37_v2, %v36_v1  ;;  %v40_v6 = vld [vmem:[#allocation2 + $0x20] sm:$0xff]  ;;  %v41_v7 = vld [vmem:[#allocation2 + $0x28] sm:$0xff]  ;;  %722 = vmatpush3.bf16.msra.mxu0 %v791_v0  ;;  %v53_v8 = vpack.c.bf16 %v39_v5, %v38_v3  ;;  %v42_v10 = vld [vmem:[#allocation2 + $0x30] sm:$0xff] }
  0x16   :  { %v54_v9 = vpack.c.bf16 %v41_v7, %v40_v6  ;;  %v43_v11 = vld [vmem:[#allocation2 + $0x38] sm:$0xff]  ;;  %v44_v12 = vld [vmem:[#allocation2 + $0x40] sm:$0xff]  ;;  %v45_v13 = vld [vmem:[#allocation2 + $0x48] sm:$0xff] }
  0x17   :  { %723 = vmatprep.mubr.msk.bf16.mxu0 %vm66_vm0, %v52_v4  ;;  %v55_v14 = vpack.c.bf16 %v43_v11, %v42_v10  ;;  %v56_v15 = vpack.c.bf16 %v45_v13, %v44_v12  ;;  %v46_v16 = vld [vmem:[#allocation2 + $0x50] sm:$0xff]  ;;  %v47_v17 = vld [vmem:[#allocation2 + $0x58] sm:$0xff]  ;;  %v48_v18 = vld [vmem:[#allocation2 + $0x60] sm:$0xff] }
  0x18   :  { %724 = vmatmul.mubr.msk.bf16.vlgmr.msra.gmra.mrb[0].mxu0 %vm66_vm0, %v53_v8  ;;  %v49_v19 = vld [vmem:[#allocation2 + $0x68] sm:$0xff]  ;;  %v57_v20 = vpack.c.bf16 %v47_v17, %v46_v16  ;;  %v50_v22 = vld [vmem:[#allocation2 + $0x70] sm:$0xff]  ;;  %v51_v23 = vld [vmem:[#allocation2 + $0x78] sm:$0xff] }
  0x19   :  { %727 = vmatprep.mubr.msk.bf16.mxu0 %vm66_vm0, %v54_v9  ;;  %v58_v21 = vpack.c.bf16 %v49_v19, %v48_v18  ;;  %v59_v24 = vpack.c.bf16 %v51_v23, %v50_v22  ;;  %v792_v25 = vld [vmem:[%s962_s1] sm:$0xff]   ;;  %v793_v32 = vld [vmem:[%s962_s1 + $0x8] sm:$0xff]   ;;  %s845_s1 = smov [#allocation5]  }
  0x1a   :  { %741 = vmatprep.mubr.msk.bf16.mxu1 %vm66_vm0, %v792_v25  ;;  %s649_s30 = sshll.u32 %s845_s1, 4  ;;  %s650_s30 = int_to_ptr.vmem [resolvable:$true] %s649_s30 }
  0x1b   :  { %s816_s4 = scalar_lea.vmem %s650_s30, 4096  ;;  %p821_p9 = scmp.lt.s32.totalorder %s650_s30, %s650_s30 }
  0x1c   :  { %p817_p8 = scmp.ne.s32.totalorder %s650_s30, %s816_s4  ;;  %p822_p10 = scmp.lt.s32.totalorder %s816_s4, %s816_s4 }
  0x1e   :  { %p823_p11 = por %p822_p10, %p821_p9 }
  0x20   :  { %728 = vmatmul.mubr.msk.bf16.gmra.mrb[4].mxu0 %vm66_vm0, %v55_v14  ;;  %p824_p12 = pnand %p823_p11, %p817_p8 }
  0x21   :  { %731 = vmatprep.mubr.msk.bf16.mxu0 %vm66_vm0, %v56_v15 }
  0x28   :  { %732 = vmatmul.mubr.msk.bf16.gmra.mrb[8].mxu0 %vm66_vm0, %v57_v20 }
  0x29   :  { %735 = vmatprep.mubr.msk.bf16.mxu0 %vm66_vm0, %v58_v21 }
  0x30   :  { %736 = vmatmul.mubr.msk.bf16.gmra.mrb[12].mxu0 %vm66_vm0, %v59_v24 }
  0x31   :  { %765 = vmatprep.mubr.msk.bf16.mxu0 %vm66_vm0, %v792_v25 }
  0xeb   :  { %v725_v26 = vpop.f32.mrb[0].mxu0 }
  0xec   :  { %v125_v27 = vpop.f32.mrb[1].mxu0 }
  0xed   :  { %v726_v28 = vpop.f32.mrb[2].mxu0 }
  0xee   :  { %v189_v29 = vpack.c.bf16 %v726_v28, %v725_v26  ;;  %v128_v30 = vpop.f32.mrb[3].mxu0 }
  0xef   :  { %v188_v31 = vpack.c.bf16 %v128_v30, %v125_v27 }
  0xf1   :  { %739 = vmatprep.subr.bf16.mxu1 %v188_v31 }
  0xf2   :  { %740 = vmatpush3.bf16.msra.mxu1 %v188_v31 }
  0xf3   :  { %v729_v33 = vpop.f32.mrb[4].mxu0  ;;  %745 = vmatprep.subr.bf16.mxu1 %v189_v29 }
  0xf4   :  { %v141_v34 = vpop.f32.mrb[5].mxu0 }
  0xf5   :  { %v730_v35 = vpop.f32.mrb[6].mxu0  ;;  %742 = vmatmul.mubr.msk.bf16.vlgmr.msra.gmra.mrb[0].mxu1 %vm66_vm0, %v793_v32 }
  0xf6   :  { %v191_v36 = vpack.c.bf16 %v730_v35, %v729_v33  ;;  %v144_v37 = vpop.f32.mrb[7].mxu0  ;;  %746 = vmatpush3.bf16.msra.mxu1 %v189_v29  ;;  %747 = vmatprep.mubr.msk.bf16.mxu1 %vm66_vm0, %v792_v25 }
  0xf7   :  { %v190_v38 = vpack.c.bf16 %v144_v37, %v141_v34 }
  0xf9   :  { %751 = vmatprep.subr.bf16.mxu1 %v190_v38 }
  0xfb   :  { %v733_v39 = vpop.f32.mrb[8].mxu0 }
  0xfc   :  { %v157_v40 = vpop.f32.mrb[9].mxu0 }
  0xfd   :  { %v734_v41 = vpop.f32.mrb[10].mxu0  ;;  %748 = vmatmul.mubr.msk.bf16.vlgmr.msra.gmra.mrb[4].mxu1 %vm66_vm0, %v793_v32 }
  0xfe   :  { %v193_v42 = vpack.c.bf16 %v734_v41, %v733_v39  ;;  %752 = vmatpush3.bf16.msra.mxu1 %v190_v38  ;;  %v160_v43 = vpop.f32.mrb[11].mxu0  ;;  %753 = vmatprep.mubr.msk.bf16.mxu1 %vm66_vm0, %v792_v25 }
  0xff   :  { %v192_v44 = vpack.c.bf16 %v160_v43, %v157_v40  ;;  %757 = vmatprep.subr.bf16.mxu1 %v191_v36 }
 0x101   :  { %763 = vmatprep.subr.bf16.mxu0 %v192_v44 }
 0x102   :  { %764 = vmatpush3.bf16.msra.mxu0 %v192_v44 }
 0x103   :  { %v737_v45 = vpop.f32.mrb[12].mxu0 }
 0x104   :  { %v173_v46 = vpop.f32.mrb[13].mxu0 }
 0x105   :  { %754 = vmatmul.mubr.msk.bf16.vlgmr.msra.gmra.mrb[8].mxu1 %vm66_vm0, %v793_v32  ;;  %v738_v47 = vpop.f32.mrb[14].mxu0  ;;  %766 = vmatmul.mubr.msk.bf16.vlgmr.msra.gmra.mrb[16].mxu0 %vm66_vm0, %v793_v32 }
 0x106   :  { %758 = vmatpush3.bf16.msra.mxu1 %v191_v36  ;;  %759 = vmatprep.mubr.msk.bf16.mxu1 %vm66_vm0, %v792_v25  ;;  %v195_v48 = vpack.c.bf16 %v738_v47, %v737_v45  ;;  %v176_v49 = vpop.f32.mrb[15].mxu0 }
 0x107   :  { %769 = vmatprep.subr.bf16.mxu1 %v193_v42  ;;  %v194_v50 = vpack.c.bf16 %v176_v49, %v173_v46  ;;  %777 = vmatprep.mubr.msk.bf16.mxu0 %vm66_vm0, %v792_v25 }
 0x109   :  { %775 = vmatprep.subr.bf16.mxu0 %v194_v50 }
 0x10a   :  { %776 = vmatpush3.bf16.msra.mxu0 %v194_v50 }
 0x10d   :  { %760 = vmatmul.mubr.msk.bf16.vlgmr.msra.gmra.mrb[12].mxu1 %vm66_vm0, %v793_v32  ;;  %778 = vmatmul.mubr.msk.bf16.vlgmr.msra.gmra.mrb[20].mxu0 %vm66_vm0, %v793_v32 }
 0x10e   :  { %770 = vmatpush3.bf16.msra.mxu1 %v193_v42  ;;  %771 = vmatprep.mubr.msk.bf16.mxu1 %vm66_vm0, %v792_v25 }
 0x10f   :  { %781 = vmatprep.subr.bf16.mxu1 %v195_v48 }
 0x115   :  { %772 = vmatmul.mubr.msk.bf16.vlgmr.msra.gmra.mrb[16].mxu1 %vm66_vm0, %v793_v32 }
 0x116   :  { %782 = vmatpush3.bf16.msra.mxu1 %v195_v48  ;;  %783 = vmatprep.mubr.msk.bf16.mxu1 %vm66_vm0, %v792_v25 }
 0x11d   :  { %784 = vmatmul.mubr.msk.bf16.vlgmr.msra.gmra.mrb[20].mxu1 %vm66_vm0, %v793_v32 }
 0x1c8   :  { %v743_v51 = vpop.f32.mrb[0].mxu1 }
 0x1c9   :  { %264 = vst.msk [vmem:[#allocation5 + $0x10] sm:$0xff] %vm261_vm1, %v743_v51  ;;  %v246_v52 = vpop.f32.mrb[1].mxu1 }
 0x1ca   :  { %262 = vst.msk [vmem:[#allocation5] sm:$0xff] %vm261_vm1, %v246_v52  ;;  %v744_v53 = vpop.f32.mrb[2].mxu1 }
 0x1cb   :  { %265 = vst.msk [vmem:[#allocation5 + $0x18] sm:$0xff] %vm261_vm1, %v744_v53  ;;  %v249_v54 = vpop.f32.mrb[3].mxu1 }
 0x1cc   :  { %263 = vst.msk [vmem:[#allocation5 + $0x8] sm:$0xff] %vm261_vm1, %v249_v54 }
 0x1d0   :  { %v749_v55 = vpop.f32.mrb[4].mxu1 }
 0x1d1   :  { %318 = vst.msk [vmem:[#allocation5 + $0x30] sm:$0xff] %vm261_vm1, %v749_v55  ;;  %v300_v56 = vpop.f32.mrb[5].mxu1 }
 0x1d2   :  { %316 = vst.msk [vmem:[#allocation5 + $0x20] sm:$0xff] %vm261_vm1, %v300_v56  ;;  %v750_v57 = vpop.f32.mrb[6].mxu1 }
 0x1d3   :  { %319 = vst.msk [vmem:[#allocation5 + $0x38] sm:$0xff] %vm261_vm1, %v750_v57  ;;  %v303_v58 = vpop.f32.mrb[7].mxu1 }
 0x1d4   :  { %317 = vst.msk [vmem:[#allocation5 + $0x28] sm:$0xff] %vm261_vm1, %v303_v58 }
 0x1d8   :  { %v755_v59 = vpop.f32.mrb[8].mxu1  ;;  %v767_v60 = vpop.f32.mrb[16].mxu0 }
 0x1d9   :  { %372 = vst.msk [vmem:[#allocation5 + $0x50] sm:$0xff] %vm261_vm1, %v755_v59  ;;  %v354_v61 = vpop.f32.mrb[9].mxu1  ;;  %480 = vst.msk [vmem:[#allocation5 + $0x90] sm:$0xff] %vm261_vm1, %v767_v60  ;;  %v462_v62 = vpop.f32.mrb[17].mxu0 }
 0x1da   :  { %370 = vst.msk [vmem:[#allocation5 + $0x40] sm:$0xff] %vm261_vm1, %v354_v61  ;;  %v756_v63 = vpop.f32.mrb[10].mxu1  ;;  %478 = vst.msk [vmem:[#allocation5 + $0x80] sm:$0xff] %vm261_vm1, %v462_v62  ;;  %v768_v0 = vpop.f32.mrb[18].mxu0 }
 0x1db   :  { %373 = vst.msk [vmem:[#allocation5 + $0x58] sm:$0xff] %vm261_vm1, %v756_v63  ;;  %v357_v1 = vpop.f32.mrb[11].mxu1  ;;  %481 = vst.msk [vmem:[#allocation5 + $0x98] sm:$0xff] %vm261_vm1, %v768_v0  ;;  %v465_v2 = vpop.f32.mrb[19].mxu0 }
 0x1dc   :  { %371 = vst.msk [vmem:[#allocation5 + $0x48] sm:$0xff] %vm261_vm1, %v357_v1  ;;  %479 = vst.msk [vmem:[#allocation5 + $0x88] sm:$0xff] %vm261_vm1, %v465_v2 }
 0x1e0   :  { %v761_v3 = vpop.f32.mrb[12].mxu1  ;;  %v779_v4 = vpop.f32.mrb[20].mxu0 }
 0x1e1   :  { %426 = vst.msk [vmem:[#allocation5 + $0x70] sm:$0xff] %vm261_vm1, %v761_v3  ;;  %v408_v5 = vpop.f32.mrb[13].mxu1  ;;  %588 = vst.msk [vmem:[#allocation5 + $0xd0] sm:$0xff] %vm261_vm1, %v779_v4  ;;  %v570_v6 = vpop.f32.mrb[21].mxu0 }
 0x1e2   :  { %424 = vst.msk [vmem:[#allocation5 + $0x60] sm:$0xff] %vm261_vm1, %v408_v5  ;;  %v762_v7 = vpop.f32.mrb[14].mxu1  ;;  %586 = vst.msk [vmem:[#allocation5 + $0xc0] sm:$0xff] %vm261_vm1, %v570_v6  ;;  %v780_v8 = vpop.f32.mrb[22].mxu0 }
 0x1e3   :  { %427 = vst.msk [vmem:[#allocation5 + $0x78] sm:$0xff] %vm261_vm1, %v762_v7  ;;  %v411_v9 = vpop.f32.mrb[15].mxu1  ;;  %589 = vst.msk [vmem:[#allocation5 + $0xd8] sm:$0xff] %vm261_vm1, %v780_v8  ;;  %v573_v10 = vpop.f32.mrb[23].mxu0 }
 0x1e4   :  { %425 = vst.msk [vmem:[#allocation5 + $0x68] sm:$0xff] %vm261_vm1, %v411_v9  ;;  %587 = vst.msk [vmem:[#allocation5 + $0xc8] sm:$0xff] %vm261_vm1, %v573_v10 }
 0x1e8   :  { %v773_v11 = vpop.f32.mrb[16].mxu1 }
 0x1e9   :  { %534 = vst.msk [vmem:[#allocation5 + $0xb0] sm:$0xff] %vm261_vm1, %v773_v11  ;;  %v516_v12 = vpop.f32.mrb[17].mxu1 }
 0x1ea   :  { %532 = vst.msk [vmem:[#allocation5 + $0xa0] sm:$0xff] %vm261_vm1, %v516_v12  ;;  %v774_v13 = vpop.f32.mrb[18].mxu1 }
 0x1eb   :  { %535 = vst.msk [vmem:[#allocation5 + $0xb8] sm:$0xff] %vm261_vm1, %v774_v13  ;;  %v519_v14 = vpop.f32.mrb[19].mxu1 }
 0x1ec   :  { %533 = vst.msk [vmem:[#allocation5 + $0xa8] sm:$0xff] %vm261_vm1, %v519_v14 }
 0x1f0   :  { %v785_v15 = vpop.f32.mrb[20].mxu1 }
 0x1f1   :  { %642 = vst.msk [vmem:[#allocation5 + $0xf0] sm:$0xff] %vm261_vm1, %v785_v15  ;;  %v624_v16 = vpop.f32.mrb[21].mxu1 }
 0x1f2   :  { %640 = vst.msk [vmem:[#allocation5 + $0xe0] sm:$0xff] %vm261_vm1, %v624_v16  ;;  %v786_v17 = vpop.f32.mrb[22].mxu1 }
 0x1f3   :  { %643 = vst.msk [vmem:[#allocation5 + $0xf8] sm:$0xff] %vm261_vm1, %v786_v17  ;;  %v627_v18 = vpop.f32.mrb[23].mxu1 }
 0x1f4   :  { %641 = vst.msk [vmem:[#allocation5 + $0xe8] sm:$0xff] %vm261_vm1, %v627_v18 }
 0x1f5   :  { %827 = shalt.err (!%p824_p12)
}
 0x1f6   :  { %s828_s7 = scalar_lea.hbm %s964_s3, 4096 }
 0x1f7   :  { %p829_p13 = scmp.ne.s32.totalorder %s964_s3, %s828_s7  ;;  %p832_p0 = scmp.lt.u32.totalorder %s828_s7, %s964_s3 }
 0x1f9   :  { %p834_p1 = pnand %p832_p0, %p829_p13 }
 0x1fb   :  { %837 = shalt.err (!%p834_p1)
}
 0x1fc   :  { %655 = dma.vmem_to_hbm [thread:$0]  %s650_s30, 4096, %s964_s3, [#allocation4], %s843_s22, %s843_s22, %s844_s23  }
 0x1fd   :  { %840 = dma.done.wait [#allocation4], 4096  }
 0x1fe   :  { %841 = vsyncadd [#allocation4], 4294963200 }
 0x1ff   :  { %659 = vsyncpa [#allocation3], 1 }
 0x200   :  { %660 = vsyncpa [#allocation4], 1 }

</bundles_post_ra>
